<compile_context>
chip_gen: v5e
topology: v5e:2x2
jax: 0.10.0
libtpu: 0.0.40
codegen_flags: <defaults>
</compile_context>

<pallas_src>
import functools
import math

import jax
import jax.numpy as jnp
from jax.experimental import pallas as pl
from jax.experimental.pallas import tpu as pltpu


def _pick_head_group(num_heads, head_dim):
    """Smallest divisor g of num_heads with g*head_dim filling the MXU lanes."""
    for target in (256, 128):       # 256 fills v6e/v7x MXU, 128 fills v5e
        for g in range(1, num_heads + 1):
            if num_heads % g == 0 and g * head_dim >= target:
                return g
    return num_heads                # tiny models: do all heads in one step


def _attention_group_kernel(x_ref, w_ref, b_ref, o_ref, *,
                            heads_per_block, head_dim):
    # x_ref : (1, S, H)        bf16 hidden states for this batch element
    # w_ref : (1, H, 3*G*D)    bf16 fused [Wq|Wk|Wv], contraction-major
    # b_ref : (1, 1, 3*G*D)    f32 fused bias
    # o_ref : (1, S, G*D)      output slice, already in (B, S, H) layout
    G, D = heads_per_block, head_dim
    GD = G * D

    x = x_ref[0]                                         # (S, H)
    w = w_ref[0]                                         # (H, 3*G*D)
    b = b_ref[0]                                         # (1, 3*G*D)

    # Fused Q/K/V projection for this head group: one MXU push, f32 accumulate.
    qkv = jnp.dot(x, w, preferred_element_type=jnp.float32) + b   # (S, 3*G*D)

    scale = 1.0 / math.sqrt(D)
    dn = (((1,), (1,)), ((), ()))                        # contract head dims (q kᵀ)
    ctxs = []
    for h in range(G):                                   # static, unrolled
        q = qkv[:, h * D:(h + 1) * D] * scale            # fold 1/sqrt(D) into q
        k = qkv[:, GD + h * D: GD + (h + 1) * D]
        v = qkv[:, 2 * GD + h * D: 2 * GD + (h + 1) * D]

        scores = jax.lax.dot_general(
            q.astype(jnp.bfloat16), k.astype(jnp.bfloat16), dn,
            preferred_element_type=jnp.float32)          # (S, S) f32

        # Numerically stable softmax along keys (f32; exp + reciprocal on EUP).
        m = jnp.max(scores, axis=-1, keepdims=True)
        p = jnp.exp(scores - m)
        denom = jnp.sum(p, axis=-1, keepdims=True)
        p = p * pl.reciprocal(denom, approx=True)

        ctx = jnp.dot(p.astype(jnp.bfloat16), v.astype(jnp.bfloat16),
                      preferred_element_type=jnp.float32)  # (S, D)
        ctxs.append(ctx)

    # Single lane-dense store of the whole head group.
    o_ref[0] = jnp.concatenate(ctxs, axis=-1).astype(o_ref.dtype)


def bert_self_attention(hidden_states, w_q, b_q, w_k, b_k, w_v, b_v, num_heads,
                        *, operand_dtype=jnp.bfloat16):
    """hidden_states: (B, S, H); w_*: (H, H) PyTorch (out, in) layout; b_*: (H,)."""
    B, S, H = hidden_states.shape
    NH = num_heads
    assert H % NH == 0
    D = H // NH
    G = _pick_head_group(NH, D)
    NG = NH // G
    GD = G * D

    # Fuse Wq|Wk|Wv per head group, pre-transposed once to contraction-major
    # (H_in, 3*G*D) so the kernel contracts rhs dim 0 (no in-kernel transpose).
    def fuse_w(w):                                   # (H_out, H_in) -> (NG, H_in, G*D)
        return jnp.transpose(w.reshape(NG, GD, H), (0, 2, 1))

    w_fused = jnp.concatenate([fuse_w(w_q), fuse_w(w_k), fuse_w(w_v)],
                              axis=-1).astype(operand_dtype)        # (NG, H, 3*G*D)
    b_fused = jnp.concatenate([b_q.reshape(NG, 1, GD),
                               b_k.reshape(NG, 1, GD),
                               b_v.reshape(NG, 1, GD)],
                              axis=-1).astype(jnp.float32)          # (NG, 1, 3*G*D)
    x_in = hidden_states.astype(operand_dtype)

    kernel = functools.partial(_attention_group_kernel,
                               heads_per_block=G, head_dim=D)

    x_item = jnp.dtype(operand_dtype).itemsize
    o_item = jnp.dtype(hidden_states.dtype).itemsize
    cost = pl.CostEstimate(
        flops=int(6 * B * S * H * H + 4 * B * S * S * H),
        transcendentals=int(B * NH * S * S),
        bytes_accessed=int(NG * B * S * H * x_item          # x streamed NG times
                           + 3 * H * H * x_item             # fused weights (once)
                           + 3 * H * 4                      # fused bias
                           + B * S * H * o_item),           # output (once)
    )

    out = pl.pallas_call(
        kernel,
        out_shape=jax.ShapeDtypeStruct((B, S, H), hidden_states.dtype),
        grid_spec=pltpu.PrefetchScalarGridSpec(
            num_scalar_prefetch=0,
            # head-group axis OUTER: each fused weight block is DMA'd once and
            # reused across every (inner) batch step.
            grid=(NG, B),
            in_specs=[
                pl.BlockSpec((1, S, H), lambda g, b: (b, 0, 0)),        # x
                pl.BlockSpec((1, H, 3 * GD), lambda g, b: (g, 0, 0)),   # fused W
                pl.BlockSpec((1, 1, 3 * GD), lambda g, b: (g, 0, 0)),   # fused bias
            ],
            # Output written directly in (B, S, H) layout — no wrapper transpose.
            out_specs=pl.BlockSpec((1, S, GD), lambda g, b: (b, 0, g)),
        ),
        compiler_params=pltpu.CompilerParams(
            dimension_semantics=("parallel", "parallel"),
            vmem_limit_bytes=48 * 1024 * 1024,   # headroom within v7x's 64 MiB VMEM
        ),
        cost_estimate=cost,
    )(x_in, w_fused, b_fused)
    return out


def _reference(hidden_states, w_q, b_q, w_k, b_k, w_v, b_v, num_heads):
    """Plain-JAX mirror of the PyTorch forward (absolute pos., no mask, eval)."""
    B, S, H = hidden_states.shape
    NH = num_heads
    D = H // NH

    def split(t):  # transpose_for_scores
        return t.reshape(B, S, NH, D).transpose(0, 2, 1, 3)

    q = split(hidden_states @ w_q.T + b_q)
    k = split(hidden_states @ w_k.T + b_k)
    v = split(hidden_states @ w_v.T + b_v)

    scores = jnp.einsum("bhqd,bhkd->bhqk", q, k) / math.sqrt(D)
    probs = jax.nn.softmax(scores, axis=-1)
    ctx = jnp.einsum("bhqk,bhkd->bhqd", probs, v)
    return ctx.transpose(0, 2, 1, 3).reshape(B, S, H)


if __name__ == "__main__":
    # Small shapes consistent with the module: batch=2, seq=8, hidden=32, 4 heads.
    B, S, H, NH = 2, 8, 32, 4

    key = jax.random.PRNGKey(0)
    kx, kwq, kbq, kwk, kbk, kwv, kbv = jax.random.split(key, 7)

    hidden_states = jax.random.normal(kx, (B, S, H), dtype=jnp.float32)
    scale = 1.0 / math.sqrt(H)
    w_q = jax.random.normal(kwq, (H, H), dtype=jnp.float32) * scale
    w_k = jax.random.normal(kwk, (H, H), dtype=jnp.float32) * scale
    w_v = jax.random.normal(kwv, (H, H), dtype=jnp.float32) * scale
    b_q = jax.random.normal(kbq, (H,), dtype=jnp.float32) * 0.01
    b_k = jax.random.normal(kbk, (H,), dtype=jnp.float32) * 0.01
    b_v = jax.random.normal(kbv, (H,), dtype=jnp.float32) * 0.01

    out = bert_self_attention(hidden_states, w_q, b_q, w_k, b_k, w_v, b_v, NH)
    out = jax.block_until_ready(out)

    ref = _reference(hidden_states, w_q, b_q, w_k, b_k, w_v, b_v, NH)
    assert out.shape == (B, S, H)
    # Tolerance accommodates bf16 matmul operands (MXU-native precision).
    assert jnp.allclose(out, ref, atol=3e-2, rtol=3e-2), (
        float(jnp.max(jnp.abs(out - ref))))

    print("KERNEL_OK")
</pallas_src>

<mosaic_0001>
module attributes {stable_mosaic.version = 11 : i64} {
  func.func @_attention_group_kernel(%arg0: i32, %arg1: i32, %arg2: memref<1x8x32xbf16, #tpu.memory_space<vmem>>, %arg3: memref<1x32x96xbf16, #tpu.memory_space<vmem>>, %arg4: memref<1x1x96xf32, #tpu.memory_space<vmem>>, %arg5: memref<1x8x32xf32, #tpu.memory_space<vmem>>) attributes {dimension_semantics = [#tpu.dimension_semantics<parallel>, #tpu.dimension_semantics<parallel>], iteration_bounds = array<i64: 1, 2>, scalar_prefetch = 0 : i64, scratch_operands = 0 : i64, tpu.core_type = #tpu.core_type<tc>, window_params = [{transform_indices = @transform_0, window_bounds = array<i64: 1, 8, 32>}, {transform_indices = @transform_1, window_bounds = array<i64: 1, 32, 96>}, {transform_indices = @transform_2, window_bounds = array<i64: 1, 1, 96>}, {transform_indices = @transform_3, window_bounds = array<i64: 1, 8, 32>}]} {
    %c0 = arith.constant 0 : index
    %c0_0 = arith.constant 0 : index
    %c0_1 = arith.constant 0 : index
    %0 = vector.load %arg2[%c0, %c0_0, %c0_1] : memref<1x8x32xbf16, #tpu.memory_space<vmem>>, vector<1x8x32xbf16>
    %1 = vector.shape_cast %0 : vector<1x8x32xbf16> to vector<8x32xbf16>
    %c0_2 = arith.constant 0 : index
    %c0_3 = arith.constant 0 : index
    %c0_4 = arith.constant 0 : index
    %2 = vector.load %arg3[%c0_2, %c0_3, %c0_4] : memref<1x32x96xbf16, #tpu.memory_space<vmem>>, vector<1x32x96xbf16>
    %3 = vector.shape_cast %2 : vector<1x32x96xbf16> to vector<32x96xbf16>
    %c0_5 = arith.constant 0 : index
    %c0_6 = arith.constant 0 : index
    %c0_7 = arith.constant 0 : index
    %4 = vector.load %arg4[%c0_5, %c0_6, %c0_7] : memref<1x1x96xf32, #tpu.memory_space<vmem>>, vector<1x1x96xf32>
    %5 = vector.shape_cast %4 : vector<1x1x96xf32> to vector<1x96xf32>
    %cst = arith.constant dense<0.000000e+00> : vector<8x96xf32>
    %6 = tpu.matmul %1, %3, %cst {dimension_numbers = #tpu.dot_dimension_numbers<[1], [0], [0], [1], [0, 0, 1, 1], [], []>} : vector<8x32xbf16>, vector<32x96xbf16>, vector<8x96xf32> -> vector<8x96xf32>
    %7 = vector.broadcast %5 : vector<1x96xf32> to vector<8x96xf32>
    %8 = arith.addf %6, %7 : vector<8x96xf32>
    %9 = vector.extract_strided_slice %8 {offsets = [0, 0], sizes = [8, 8], strides = [1, 1]} : vector<8x96xf32> to vector<8x8xf32>
    %cst_8 = arith.constant 0.353553385 : f32
    %10 = vector.broadcast %cst_8 : f32 to vector<8x8xf32>
    %11 = arith.mulf %9, %10 : vector<8x8xf32>
    %12 = vector.extract_strided_slice %8 {offsets = [0, 32], sizes = [8, 8], strides = [1, 1]} : vector<8x96xf32> to vector<8x8xf32>
    %13 = vector.extract_strided_slice %8 {offsets = [0, 64], sizes = [8, 8], strides = [1, 1]} : vector<8x96xf32> to vector<8x8xf32>
    %14 = arith.truncf %11 : vector<8x8xf32> to vector<8x8xbf16>
    %15 = arith.truncf %12 : vector<8x8xf32> to vector<8x8xbf16>
    %cst_9 = arith.constant dense<0.000000e+00> : vector<8x8xf32>
    %16 = tpu.matmul %14, %15, %cst_9 {dimension_numbers = #tpu.dot_dimension_numbers<[1], [1], [0], [0], [0, 0, 1, 0], [], []>} : vector<8x8xbf16>, vector<8x8xbf16>, vector<8x8xf32> -> vector<8x8xf32>
    %cst_10 = arith.constant dense<0xFF800000> : vector<8xf32>
    %17 = vector.multi_reduction <maximumf>, %16, %cst_10 [1] : vector<8x8xf32> to vector<8xf32>
    %18 = vector.shape_cast %17 : vector<8xf32> to vector<8x1xf32>
    %19 = vector.broadcast %18 : vector<8x1xf32> to vector<8x8xf32>
    %20 = arith.subf %16, %19 : vector<8x8xf32>
    %21 = math.exp %20 : vector<8x8xf32>
    %cst_11 = arith.constant dense<0.000000e+00> : vector<8xf32>
    %22 = vector.multi_reduction <add>, %21, %cst_11 [1] : vector<8x8xf32> to vector<8xf32>
    %23 = vector.shape_cast %22 : vector<8xf32> to vector<8x1xf32>
    %24 = tpu.reciprocal %23 {approx = true} : vector<8x1xf32> -> vector<8x1xf32>
    %25 = vector.broadcast %24 : vector<8x1xf32> to vector<8x8xf32>
    %26 = arith.mulf %21, %25 : vector<8x8xf32>
    %27 = arith.truncf %26 : vector<8x8xf32> to vector<8x8xbf16>
    %28 = arith.truncf %13 : vector<8x8xf32> to vector<8x8xbf16>
    %cst_12 = arith.constant dense<0.000000e+00> : vector<8x8xf32>
    %29 = tpu.matmul %27, %28, %cst_12 {dimension_numbers = #tpu.dot_dimension_numbers<[1], [0], [0], [1], [0, 0, 1, 1], [], []>} : vector<8x8xbf16>, vector<8x8xbf16>, vector<8x8xf32> -> vector<8x8xf32>
    %30 = vector.extract_strided_slice %8 {offsets = [0, 8], sizes = [8, 8], strides = [1, 1]} : vector<8x96xf32> to vector<8x8xf32>
    %cst_13 = arith.constant 0.353553385 : f32
    %31 = vector.broadcast %cst_13 : f32 to vector<8x8xf32>
    %32 = arith.mulf %30, %31 : vector<8x8xf32>
    %33 = vector.extract_strided_slice %8 {offsets = [0, 40], sizes = [8, 8], strides = [1, 1]} : vector<8x96xf32> to vector<8x8xf32>
    %34 = vector.extract_strided_slice %8 {offsets = [0, 72], sizes = [8, 8], strides = [1, 1]} : vector<8x96xf32> to vector<8x8xf32>
    %35 = arith.truncf %32 : vector<8x8xf32> to vector<8x8xbf16>
    %36 = arith.truncf %33 : vector<8x8xf32> to vector<8x8xbf16>
    %cst_14 = arith.constant dense<0.000000e+00> : vector<8x8xf32>
    %37 = tpu.matmul %35, %36, %cst_14 {dimension_numbers = #tpu.dot_dimension_numbers<[1], [1], [0], [0], [0, 0, 1, 0], [], []>} : vector<8x8xbf16>, vector<8x8xbf16>, vector<8x8xf32> -> vector<8x8xf32>
    %cst_15 = arith.constant dense<0xFF800000> : vector<8xf32>
    %38 = vector.multi_reduction <maximumf>, %37, %cst_15 [1] : vector<8x8xf32> to vector<8xf32>
    %39 = vector.shape_cast %38 : vector<8xf32> to vector<8x1xf32>
    %40 = vector.broadcast %39 : vector<8x1xf32> to vector<8x8xf32>
    %41 = arith.subf %37, %40 : vector<8x8xf32>
    %42 = math.exp %41 : vector<8x8xf32>
    %cst_16 = arith.constant dense<0.000000e+00> : vector<8xf32>
    %43 = vector.multi_reduction <add>, %42, %cst_16 [1] : vector<8x8xf32> to vector<8xf32>
    %44 = vector.shape_cast %43 : vector<8xf32> to vector<8x1xf32>
    %45 = tpu.reciprocal %44 {approx = true} : vector<8x1xf32> -> vector<8x1xf32>
    %46 = vector.broadcast %45 : vector<8x1xf32> to vector<8x8xf32>
    %47 = arith.mulf %42, %46 : vector<8x8xf32>
    %48 = arith.truncf %47 : vector<8x8xf32> to vector<8x8xbf16>
    %49 = arith.truncf %34 : vector<8x8xf32> to vector<8x8xbf16>
    %cst_17 = arith.constant dense<0.000000e+00> : vector<8x8xf32>
    %50 = tpu.matmul %48, %49, %cst_17 {dimension_numbers = #tpu.dot_dimension_numbers<[1], [0], [0], [1], [0, 0, 1, 1], [], []>} : vector<8x8xbf16>, vector<8x8xbf16>, vector<8x8xf32> -> vector<8x8xf32>
    %51 = vector.extract_strided_slice %8 {offsets = [0, 16], sizes = [8, 8], strides = [1, 1]} : vector<8x96xf32> to vector<8x8xf32>
    %cst_18 = arith.constant 0.353553385 : f32
    %52 = vector.broadcast %cst_18 : f32 to vector<8x8xf32>
    %53 = arith.mulf %51, %52 : vector<8x8xf32>
    %54 = vector.extract_strided_slice %8 {offsets = [0, 48], sizes = [8, 8], strides = [1, 1]} : vector<8x96xf32> to vector<8x8xf32>
    %55 = vector.extract_strided_slice %8 {offsets = [0, 80], sizes = [8, 8], strides = [1, 1]} : vector<8x96xf32> to vector<8x8xf32>
    %56 = arith.truncf %53 : vector<8x8xf32> to vector<8x8xbf16>
    %57 = arith.truncf %54 : vector<8x8xf32> to vector<8x8xbf16>
    %cst_19 = arith.constant dense<0.000000e+00> : vector<8x8xf32>
    %58 = tpu.matmul %56, %57, %cst_19 {dimension_numbers = #tpu.dot_dimension_numbers<[1], [1], [0], [0], [0, 0, 1, 0], [], []>} : vector<8x8xbf16>, vector<8x8xbf16>, vector<8x8xf32> -> vector<8x8xf32>
    %cst_20 = arith.constant dense<0xFF800000> : vector<8xf32>
    %59 = vector.multi_reduction <maximumf>, %58, %cst_20 [1] : vector<8x8xf32> to vector<8xf32>
    %60 = vector.shape_cast %59 : vector<8xf32> to vector<8x1xf32>
    %61 = vector.broadcast %60 : vector<8x1xf32> to vector<8x8xf32>
    %62 = arith.subf %58, %61 : vector<8x8xf32>
    %63 = math.exp %62 : vector<8x8xf32>
    %cst_21 = arith.constant dense<0.000000e+00> : vector<8xf32>
    %64 = vector.multi_reduction <add>, %63, %cst_21 [1] : vector<8x8xf32> to vector<8xf32>
    %65 = vector.shape_cast %64 : vector<8xf32> to vector<8x1xf32>
    %66 = tpu.reciprocal %65 {approx = true} : vector<8x1xf32> -> vector<8x1xf32>
    %67 = vector.broadcast %66 : vector<8x1xf32> to vector<8x8xf32>
    %68 = arith.mulf %63, %67 : vector<8x8xf32>
    %69 = arith.truncf %68 : vector<8x8xf32> to vector<8x8xbf16>
    %70 = arith.truncf %55 : vector<8x8xf32> to vector<8x8xbf16>
    %cst_22 = arith.constant dense<0.000000e+00> : vector<8x8xf32>
    %71 = tpu.matmul %69, %70, %cst_22 {dimension_numbers = #tpu.dot_dimension_numbers<[1], [0], [0], [1], [0, 0, 1, 1], [], []>} : vector<8x8xbf16>, vector<8x8xbf16>, vector<8x8xf32> -> vector<8x8xf32>
    %72 = vector.extract_strided_slice %8 {offsets = [0, 24], sizes = [8, 8], strides = [1, 1]} : vector<8x96xf32> to vector<8x8xf32>
    %cst_23 = arith.constant 0.353553385 : f32
    %73 = vector.broadcast %cst_23 : f32 to vector<8x8xf32>
    %74 = arith.mulf %72, %73 : vector<8x8xf32>
    %75 = vector.extract_strided_slice %8 {offsets = [0, 56], sizes = [8, 8], strides = [1, 1]} : vector<8x96xf32> to vector<8x8xf32>
    %76 = vector.extract_strided_slice %8 {offsets = [0, 88], sizes = [8, 8], strides = [1, 1]} : vector<8x96xf32> to vector<8x8xf32>
    %77 = arith.truncf %74 : vector<8x8xf32> to vector<8x8xbf16>
    %78 = arith.truncf %75 : vector<8x8xf32> to vector<8x8xbf16>
    %cst_24 = arith.constant dense<0.000000e+00> : vector<8x8xf32>
    %79 = tpu.matmul %77, %78, %cst_24 {dimension_numbers = #tpu.dot_dimension_numbers<[1], [1], [0], [0], [0, 0, 1, 0], [], []>} : vector<8x8xbf16>, vector<8x8xbf16>, vector<8x8xf32> -> vector<8x8xf32>
    %cst_25 = arith.constant dense<0xFF800000> : vector<8xf32>
    %80 = vector.multi_reduction <maximumf>, %79, %cst_25 [1] : vector<8x8xf32> to vector<8xf32>
    %81 = vector.shape_cast %80 : vector<8xf32> to vector<8x1xf32>
    %82 = vector.broadcast %81 : vector<8x1xf32> to vector<8x8xf32>
    %83 = arith.subf %79, %82 : vector<8x8xf32>
    %84 = math.exp %83 : vector<8x8xf32>
    %cst_26 = arith.constant dense<0.000000e+00> : vector<8xf32>
    %85 = vector.multi_reduction <add>, %84, %cst_26 [1] : vector<8x8xf32> to vector<8xf32>
    %86 = vector.shape_cast %85 : vector<8xf32> to vector<8x1xf32>
    %87 = tpu.reciprocal %86 {approx = true} : vector<8x1xf32> -> vector<8x1xf32>
    %88 = vector.broadcast %87 : vector<8x1xf32> to vector<8x8xf32>
    %89 = arith.mulf %84, %88 : vector<8x8xf32>
    %90 = arith.truncf %89 : vector<8x8xf32> to vector<8x8xbf16>
    %91 = arith.truncf %76 : vector<8x8xf32> to vector<8x8xbf16>
    %cst_27 = arith.constant dense<0.000000e+00> : vector<8x8xf32>
    %92 = tpu.matmul %90, %91, %cst_27 {dimension_numbers = #tpu.dot_dimension_numbers<[1], [0], [0], [1], [0, 0, 1, 1], [], []>} : vector<8x8xbf16>, vector<8x8xbf16>, vector<8x8xf32> -> vector<8x8xf32>
    %93 = tpu.concatenate %29, %50, %71, %92 in 1 : vector<8x8xf32>, vector<8x8xf32>, vector<8x8xf32>, vector<8x8xf32> -> vector<8x32xf32>
    %c0_28 = arith.constant 0 : index
    %c0_29 = arith.constant 0 : index
    %c0_30 = arith.constant 0 : index
    %94 = vector.load %arg5[%c0_28, %c0_29, %c0_30] : memref<1x8x32xf32, #tpu.memory_space<vmem>>, vector<1x8x32xf32>
    %95 = vector.shape_cast %94 : vector<1x8x32xf32> to vector<8x32xf32>
    %96 = vector.shape_cast %93 : vector<8x32xf32> to vector<1x8x32xf32>
    tpu.vector_store %arg5[%c0_28, %c0_29, %c0_30], %96 {strides = array<i32>} : memref<1x8x32xf32, #tpu.memory_space<vmem>>, vector<1x8x32xf32>,
    return
  }
  func.func @transform_0(%arg0: i32, %arg1: i32) -> (i32, i32, i32) {
    %c0_i32 = arith.constant 0 : i32
    %c0_i32_0 = arith.constant 0 : i32
    %c0_i32_1 = arith.constant 0 : i32
    return %arg1, %c0_i32, %c0_i32_0 : i32, i32, i32
  }
  func.func @transform_1(%arg0: i32, %arg1: i32) -> (i32, i32, i32) {
    %c0_i32 = arith.constant 0 : i32
    %c0_i32_0 = arith.constant 0 : i32
    %c0_i32_1 = arith.constant 0 : i32
    return %arg0, %c0_i32, %c0_i32_0 : i32, i32, i32
  }
  func.func @transform_2(%arg0: i32, %arg1: i32) -> (i32, i32, i32) {
    %c0_i32 = arith.constant 0 : i32
    %c0_i32_0 = arith.constant 0 : i32
    %c0_i32_1 = arith.constant 0 : i32
    return %arg0, %c0_i32, %c0_i32_0 : i32, i32, i32
  }
  func.func @transform_3(%arg0: i32, %arg1: i32) -> (i32, i32, i32) {
    %c0_i32 = arith.constant 0 : i32
    %c0_i32_0 = arith.constant 0 : i32
    return %arg1, %c0_i32, %arg0 : i32, i32, i32
  }
}

</mosaic_0001>

<bundles_post_ra>
// kernel: tpu_custom_call.1
= control target key start
LH: loop header
LB: loop body
LE: loop exit
PB: predicated region body
PF: predicated region fallthrough
CT: control target
= control target key end

     0   :  { %8 = vsyncpa [#allocation3], 0  ;;  %s1157_s0 = inlined_call_operand.hbm [shape: bf16[2,8,32], index: 0, kind: input, shape index: {}]   ;;  %s1158_s1 = inlined_call_operand.hbm [shape: bf16[1,32,96], index: 1, kind: input, shape index: {}]   ;;  %s1159_s2 = inlined_call_operand.vmem [shape: f32[1,1,96], index: 2, kind: input, shape index: {}]   ;;  %s1160_s3 = inlined_call_operand.hbm [shape: f32[2,8,32], index: 3, kind: output, shape index: {}]  }
   0x1   :  { %10 = vsyncpa [#allocation3 + $0x1], 0 }
   0x2   :  { %11 = vsyncpa [#allocation6], 0 }
   0x3   :  { %12 = vsyncpa [#allocation4], 0 }
   0x4   :  { %14 = vsyncpa [#allocation4 + $0x1], 0  ;;  %s973_s12 = smov 0   ;;  %s975_s13 = smov 0  }
   0x5   :  { %s977_s14 = smov 0   ;;  %s979_s15 = smov 0  }
   0x6   :  { %s981_s16 = smov 0   ;;  %s983_s17 = smov 0  }
   0x7 LB: > { %s647_s18 = sadd.s32 4294967295, %s934_s17   ;;  %p649_p0 = scmp.ge.s32.totalorder %s934_s17, 1  ;;  %s934_s17 = sphi %s983_s17, %s20_s17   ;;  %s930_s16 = sphi %s981_s16, %s1171_s16   ;;  %s926_s15 = sphi %s979_s15, %s1170_s15   ;;  %s922_s14 = sphi %s977_s14, %s1169_s14   ;;  %s918_s13 = sphi %s975_s13, %s1168_s13   ;;  %s914_s12 = sphi %s973_s12, %s1167_s12  }
   0x8   : > { %p1005_p1 = scmp.eq.s32.totalorder %s647_s18, 0  ;;  %p143_p2 = scmp.lt.s32.totalorder %s934_s17, 3 }
   0x9   : > { %s157_s22 = sshll.u32 %s1158_s1, 4  ;;  %s936_s24 = smov [#allocation5]   ;;  %s158_s22 = int_to_ptr.hbm [resolvable:$true] %s157_s22 }
   0xa   : > { %p1013_p3 = pnand %p649_p0, %p143_p2  ;;  %s159_s25 = sshll.u32 %s936_s24, 4  ;;  %s160_s25 = int_to_ptr.vmem [resolvable:$true] %s159_s25 }
   0xb   : > { %p652_p6 = scmp.ge.s32.totalorder %s934_s17, 2  ;;  %s937_s26 = smov 64  }
   0xc   : > { %p690_p4 = pneg %p1013_p3  ;;  %s938_s27 = smov 4  }
   0xd   : > { %s648_s28 = sadd.s32 4294967294, %s934_s17   ;;  %s29_s29 = sadd.s32 1, %s930_s16 }
   0xe   : > { %p691_p5 = pnand %p690_p4, %p1005_p1  ;;  %s39_s30 = sadd.s32 1, %s922_s14 }
   0xf   : > { %p30_p7 = scmp.ge.s32.totalorder %s29_s29, 2  ;;  %p46_p8 = scmp.ne.s32.totalorder %s922_s14, %s918_s13 }
  0x10   : > { %693 = dma.hbm_to_vmem [thread:$0]  (!%p691_p5), %s158_s22, 256, %s160_s25, [#allocation6], %s937_s26, %s937_s26, %s938_s27  }
  0x11   : > { %p47_p9 = scmp.eq.s32.totalorder %s934_s17, 0  ;;  %p52_p10 = scmp.ne.s32.totalorder %s918_s13, %s914_s12 }
  0x12   : > { %s1173_s29 = smov (%p30_p7, %s29_s29), 0  ;;  %p130_p13 = scmp.eq.s32.totalorder %s647_s18, 1 }
  0x13   : > { %p1032_p11 = por %p47_p9, %p46_p8  ;;  %p1038_p12 = por %p1005_p1, %p52_p10 }
  0x14   : > { %s36_s6 = ssub.s32 %s930_s16, %s1173_s29  ;;  %p136_p2 = scmp.eq.s32.totalorder %s648_s28, 1 }
  0x15   : > { %p37_p0 = scmp.eq.s32.totalorder %s36_s6, 0  ;;  %p1044_p4 = por %p130_p13, %p46_p8 }
  0x16   : > { %p703_p5 = scmp.lt.s32.totalorder %s934_s17, 2  ;;  %p1052_p7 = por %p136_p2, %p52_p10 }
  0x17   : > { %s1050_s8 = scalar_select %p37_p0, %s922_s14, %s39_s30  }
  0x18   : > { %s179_s10 = sand.u32 1, %s922_s14   ;;  %s654_s20 = sshll.u32 %s930_s16, 2 }
  0x19   : > { %s653_s11 = sshll.u32 %s179_s10, 2  ;;  %s187_s18 = scalar_lea.hbm %s1157_s0, %s654_s20 }
  0x1a   : > { %s183_s24 = scalar_lea.vmem [#allocation2], %s653_s11  ;;  %s189_s26 = sshll.u32 %s187_s18, 4  ;;  %s190_s26 = int_to_ptr.hbm [resolvable:$true] %s189_s26 }
  0x1b   : > { %s191_s25 = sshll.u32 %s183_s24, 4  ;;  %p695_p8 = pnand %p703_p5, %p1032_p11  ;;  %s192_s25 = int_to_ptr.vmem [resolvable:$true] %s191_s25 }
  0x1c   : > { %s180_s27 = scalar_lea.sflag [#allocation3], %s179_s10  ;;  %200 = sbr.rel (%p1013_p3) target bundleno = 976 (0x3d0), region = 32 }
  0x1d   : > { %697 = dma.hbm_to_vmem [thread:$0]  (!%p695_p8), %s190_s26, 64, %s192_s25, %s180_s27  }
  0x1e   : > { %s1066_s28 = sand.u32 (!%p1013_p3), 1, %s918_s13  }
  0x1f   : > { %s656_s30 = sshll.u32 (!%p1013_p3), %s1066_s28, 2  ;;  %s203_s6 = scalar_lea.sflag (!%p1013_p3), [#allocation3], %s1066_s28 }
  0x20   : > { %s206_s11 = scalar_lea.vmem (!%p1013_p3), [#allocation2], %s656_s30 }
  0x21   : > { %901 = dma.done.wait (%p1038_p12), %s203_s6, 64  }
  0x22   : > { %903 = vsyncadd (%p1038_p12), %s203_s6, 4294967232 }
  0x23   : > { %905 = dma.done.wait (%p1005_p1), [#allocation6], 256  }
  0x24   : > { %907 = vsyncadd (%p1005_p1), [#allocation6], 4294967040  ;;  %v681_v0 = vld [vmem:[#allocation5 + $0x8] sm:$0xff]  ;;  %v680_v1 = vld [vmem:[#allocation5] sm:$0xff]  ;;  %vm263_vm0 = vcmask 261120   ;;  %s939_s19 = smov 96  }
  0x25   : > { %273 = vmatpush.bf16.msra.mxu0 %v681_v0  ;;  %v242_v2 = vld [vmem:[%s206_s11] sm:$0xf]  ;;  %s940_s5 = smov 104   ;;  %s941_s10 = smov 120   ;;  %vm286_vm1 = vcmask 64512   ;;  %vm323_vm2 = vcmask 1043456  }
  0x26   : > { %v771_v3 = vld [vmem:[%s1159_s2] ss:$0 sm:$0xff]  ;;  %s942_s20 = smov 88   ;;  %s943_s21 = smov 80   ;;  %vm522_vm3 = vcmask 130048   ;;  %vm524_vm4 = vcmask 195584  }
  0x27   : > { %s944_s22 = smov 72   ;;  %s945_s18 = smov 112  }
  0x28   : > { %s946_s24 = smov 64   ;;  %s947_s25 = smov 40  }
  0x29   : > { %274 = vmatpush.bf16.msra.mxu0 %v680_v1  ;;  %s948_s26 = smov 56   ;;  %s949_s27 = smov 48  }
  0x2a   : > { %s950_s30 = smov 8   ;;  %s951_s6 = smov 16  }
  0x2b   : > { %s952_s11 = smov 24   ;;  %s658_s23 = sshll.u32 %s1066_s28, 3 }
  0x2c   : > { %667 = vmatmul.msk.bf16.vlgmr.msra.gmra.mxu0 %vm263_vm0, %v242_v2  ;;  %s677_s4 = sshll.u32 %s926_s15, 3  ;;  %s528_s15 = scalar_lea.sflag [#allocation4], %s1066_s28 }
  0xa9   : > { %v276_v4 = vpop.f32.mrf.mxu0 }
  0xaa   : > { %v277_v5 = vadd.f32 %v771_v3, %v276_v4 }
  0xac   : > { %v280_v6 = vmul.f32 0.35355338, %v277_v5  ;;  %v1082_v7 = vpack.c.bf16 %v277_v5, %v277_v5 }
  0xae   : > { %v281_v8 = vpack.c.bf16 %v280_v6, %v280_v6  ;;  %284 = vrot.lane.b32.xlu0 %v1082_v7, %s939_s19 }
  0xb0   : > { %453 = vrot.lane.b32.xlu2 %v281_v8, %s940_s5  ;;  %341 = vrot.lane.b32.xlu1 %v281_v8, %s941_s10  ;;  %s539_s10 = scalar_lea.hbm %s1160_s3, %s677_s4 }
  0xb1   : > { %v278_v9 = vpop.f32.mrf.mxu0 }
  0xb6   : > { %343 = vrot.lane.b32.xlu0 %v1082_v7, %s942_s20  ;;  %s237_s20 = scalar_lea.vmem [#allocation7], %s658_s23 }
  0xb8   : > { %399 = vrot.lane.b32.xlu2 %v1082_v7, %s943_s21  ;;  %455 = vrot.lane.b32.xlu1 %v1082_v7, %s944_s22  ;;  %s541_s21 = sshll.u32 %s237_s20, 4  ;;  %s543_s22 = sshll.u32 %s539_s10, 4  ;;  %s542_s21 = int_to_ptr.vmem [resolvable:$true] %s541_s21  ;;  %s544_s22 = int_to_ptr.hbm [resolvable:$true] %s543_s22 }
  0xbe   : > { %397 = vrot.lane.b32.xlu0 %v281_v8, %s945_s18  ;;  %s862_s18 = sshra.s32 %s544_s22, 4  ;;  %s863_s18 = int_to_ptr.hbm [resolvable:$true] %s862_s18 }
  0xbf   : > { %p869_p10 = scmp.lt.s32.totalorder %s863_s18, %s1160_s3 }
 0x10a   : > { %v454_v10 = vpop.permute.xlu2 %453 }
 0x112   : > { %v400_v11 = vpop.permute.xlu2 %399 }
 0x113   : > { %v405_v12 = vsel %vm286_vm1, %v400_v11, 0 }
 0x114   : > { %414 = vmatpush.bf16.xpose.msrb.mxu0 %v405_v12 }
 0x120   : > { %v285_v13 = vpop.permute.xlu0 %284 }
 0x121   : > { %v291_v14 = vsel %vm286_vm1, %v285_v13, 0 }
 0x122   : > { %300 = vmatpush.bf16.xpose.msra.mxu1 %v291_v14  ;;  %v342_v15 = vpop.permute.xlu1 %341 }
 0x128   : > { %v344_v16 = vpop.permute.xlu0 %343 }
 0x129   : > { %668 = vmatmul.msk.bf16.vlgmr.msra.gmra.mxu1 %vm286_vm1, %v281_v8  ;;  %v349_v17 = vsel %vm286_vm1, %v344_v16, 0 }
 0x12a   : > { %358 = vmatpush.bf16.xpose.msra.mxu3 %v349_v17  ;;  %v456_v18 = vpop.permute.xlu1 %455 }
 0x12b   : > { %v461_v19 = vsel %vm286_vm1, %v456_v18, 0 }
 0x130   : > { %v398_v20 = vpop.permute.xlu0 %397 }
 0x131   : > { %670 = vmatmul.msk.bf16.vlgmr.msra.gmra.mxu3 %vm286_vm1, %v342_v15  ;;  %672 = vmatmul.msk.bf16.vlgmr.msrb.gmra.mxu0 %vm286_vm1, %v398_v20 }
 0x132   : > { %470 = vmatpush.bf16.xpose.msrb.mxu3 %v461_v19 }
 0x141   : > { %674 = vmatmul.msk.bf16.vlgmr.msrb.gmra.mxu3 %vm286_vm1, %v454_v10 }
 0x1a6   : > { %v302_v21 = vpop.f32.mrf.mxu1 }
 0x1a7   : > { %v306_v22 = vsel %vm286_vm1, %v302_v21, -inf }
 0x1a8   : > { %307 = vmax.xlane.f32.xlu1 %v306_v22 }
 0x1ae   : > { %v304_v23 = vpop.f32.mrf.mxu1  ;;  %v416_v24 = vpop.f32.mrf.mxu0 }
 0x1af   : > { %v420_v29 = vsel %vm286_vm1, %v416_v24, -inf }
 0x1b4   : > { %v360_v25 = vpop.f32.mrf.mxu3 }
 0x1b5   : > { %v364_v26 = vsel %vm286_vm1, %v360_v25, -inf }
 0x1b6   : > { %v418_v27 = vpop.f32.mrf.mxu0  ;;  %365 = vmax.xlane.f32.xlu2 %v364_v26 }
 0x1bc   : > { %v362_v28 = vpop.f32.mrf.mxu3 }
 0x1be   : > { %421 = vmax.xlane.f32.xlu2 %v420_v29 }
 0x1c4   : > { %v472_v30 = vpop.f32.mrf.mxu3 }
 0x1c5   : > { %v476_v31 = vsel %vm286_vm1, %v472_v30, -inf }
 0x1c6   : > { %477 = vmax.xlane.f32.xlu0 %v476_v31 }
 0x1cc   : > { %v474_v32 = vpop.f32.mrf.mxu3 }
 0x1d6   : > { %318 = vrot.lane.b32.xlu2 %v1082_v7, %s946_s24  ;;  %s864_s24 = scalar_lea.hbm %s863_s18, 8 }
 0x1d7   : > { %p865_p1 = scmp.ne.s32.totalorder %s863_s18, %s864_s24 }
 0x1d9   : > { %p866_p3 = pnand %p865_p1, %p1044_p4 }
 0x1db   : > { %p867_p9 = pneg %p866_p3 }
 0x1de   : > { %488 = vrot.lane.b32.xlu2 %v1082_v7, %s947_s25 }
 0x21b   : > { %v308_v33 = vpop.xlane.xlu1 %307 }
 0x21c   : > { %v309_v34 = vsub.f32 %v302_v21, %v308_v33 }
 0x21e   : > { %v310_v35 = vmul.f32 1.442695, %v309_v34 }
 0x220   : > { %772 = vpow2.f32 %v310_v35 }
 0x226   : > { %v773_v36 = vpop.eup %772 }
 0x227   : > { %v312_v37 = vsel %vm286_vm1, %v773_v36, 0.0 }
 0x228   : > { %313 = vadd.xlane.f32.xlu1 %v312_v37 }
 0x229   : > { %v366_v38 = vpop.xlane.xlu2 %365 }
 0x22a   : > { %v367_v41 = vsub.f32 %v360_v25, %v366_v38 }
 0x22c   : > { %v368_v43 = vmul.f32 1.442695, %v367_v41 }
 0x231   : > { %v422_v39 = vpop.xlane.xlu2 %421 }
 0x232   : > { %v423_v40 = vsub.f32 %v416_v24, %v422_v39 }
 0x234   : > { %v424_v42 = vmul.f32 1.442695, %v423_v40 }
 0x236   : > { %774 = vpow2.f32 %v424_v42 }
 0x237   : > { %776 = vpow2.f32 %v368_v43 }
 0x239   : > { %v319_v44 = vpop.permute.xlu2 %318  ;;  %v478_v45 = vpop.xlane.xlu0 %477 }
 0x23a   : > { %v325_v46 = vsel %vm323_vm2, %v319_v44, 0  ;;  %v479_v48 = vsub.f32 %v472_v30, %v478_v45 }
 0x23b   : > { %334 = vmatpush.bf16.msra.mxu2 %v325_v46 }
 0x23c   : > { %v775_v47 = vpop.eup %774  ;;  %v480_v50 = vmul.f32 1.442695, %v479_v48 }
 0x23d   : > { %v426_v49 = vsel %vm286_vm1, %v775_v47, 0.0  ;;  %v777_v51 = vpop.eup %776 }
 0x23e   : > { %427 = vadd.xlane.f32.xlu0 %v426_v49  ;;  %778 = vpow2.f32 %v480_v50  ;;  %v370_v52 = vsel %vm286_vm1, %v777_v51, 0.0 }
 0x241   : > { %376 = vrot.lane.b32.xlu1 %v1082_v7, %s948_s26  ;;  %v489_v60 = vpop.permute.xlu2 %488 }
 0x242   : > { %v494_v63 = vsel %vm323_vm2, %v489_v60, 0 }
 0x244   : > { %v779_v53 = vpop.eup %778 }
 0x245   : > { %v482_v54 = vsel %vm286_vm1, %v779_v53, 0.0 }
 0x246   : > { %371 = vadd.xlane.f32.xlu0 %v370_v52 }
 0x24e   : > { %483 = vadd.xlane.f32.xlu0 %v482_v54 }
 0x262   : > { %432 = vrot.lane.b32.xlu0 %v1082_v7, %s949_s27  ;;  %s868_s27 = scalar_lea.hbm %s1160_s3, 16 }
 0x263   : > { %p870_p11 = scmp.lt.s32.totalorder %s868_s27, %s864_s24 }
 0x265   : > { %p871_p12 = por %p870_p11, %p869_p10 }
 0x267   : > { %p872_p13 = pnand %p871_p12, %p867_p9 }
 0x29b   : > { %v314_v55 = vpop.xlane.xlu1 %313 }
 0x29c   : > { %780 = vrcp.f32 %v314_v55 }
 0x2a2   : > { %v781_v56 = vpop.eup %780 }
 0x2a3   : > { %v316_v57 = vmul.f32 %v781_v56, %v773_v36 }
 0x2a5   : > { %v317_v58 = vpack.c.bf16 %v316_v57, %v316_v57 }
 0x2a7   : > { %669 = vmatmul.msk.bf16.vlgmr.msra.gmra.mxu2 %vm286_vm1, %v317_v58 }
 0x2b1   : > { %v428_v59 = vpop.xlane.xlu0 %427 }
 0x2b3   : > { %v377_v61 = vpop.permute.xlu1 %376 }
 0x2b4   : > { %v382_v62 = vsel %vm323_vm2, %v377_v61, 0 }
 0x2b5   : > { %391 = vmatpush.bf16.msrb.mxu2 %v382_v62 }
 0x2b9   : > { %503 = vmatpush.bf16.msra.mxu2 %v494_v63  ;;  %v372_v0 = vpop.xlane.xlu0 %371 }
 0x2ba   : > { %782 = vrcp.f32 %v372_v0 }
 0x2c0   : > { %v783_v1 = vpop.eup %782 }
 0x2c1   : > { %v374_v2 = vmul.f32 %v783_v1, %v777_v51  ;;  %v484_v3 = vpop.xlane.xlu0 %483 }
 0x2c2   : > { %784 = vrcp.f32 %v484_v3 }
 0x2c3   : > { %v375_v4 = vpack.c.bf16 %v374_v2, %v374_v2  ;;  %786 = vrcp.f32 %v428_v59 }
 0x2c5   : > { %671 = vmatmul.msk.bf16.vlgmr.msrb.gmra.mxu2 %vm286_vm1, %v375_v4 }
 0x2c8   : > { %v785_v5 = vpop.eup %784 }
 0x2c9   : > { %v486_v6 = vmul.f32 %v785_v5, %v779_v53  ;;  %v787_v7 = vpop.eup %786 }
 0x2ca   : > { %v430_v8 = vmul.f32 %v787_v7, %v775_v47 }
 0x2cb   : > { %v487_v9 = vpack.c.bf16 %v486_v6, %v486_v6 }
 0x2cc   : > { %v431_v12 = vpack.c.bf16 %v430_v8, %v430_v8 }
 0x2d4   : > { %v433_v10 = vpop.permute.xlu0 %432 }
 0x2d5   : > { %675 = vmatmul.msk.bf16.vlgmr.msra.gmra.mxu2 %vm286_vm1, %v487_v9  ;;  %v438_v11 = vsel %vm323_vm2, %v433_v10, 0 }
 0x2d6   : > { %447 = vmatpush.bf16.msrb.mxu1 %v438_v11 }
 0x2d9   : > { %673 = vmatmul.msk.bf16.vlgmr.msrb.gmra.mxu1 %vm286_vm1, %v431_v12 }
 0x32a   : > { %v336_v13 = vpop.f32.mrf.mxu2 }
 0x332   : > { %v338_v14 = vpop.f32.mrf.mxu2 }
 0x348   : > { %v393_v15 = vpop.f32.mrf.mxu2 }
 0x349   : > { %510 = vrot.lane.b32.xlu1 %v393_v15, %s950_s30 }
 0x350   : > { %v395_v16 = vpop.f32.mrf.mxu2 }
 0x356   : > { %v449_v17 = vpop.f32.mrf.mxu1 }
 0x357   : > { %514 = vrot.lane.b32.xlu2 %v449_v17, %s951_s6 }
 0x358   : > { %v505_v18 = vpop.f32.mrf.mxu2 }
 0x359   : > { %518 = vrot.lane.b32.xlu1 %v505_v18, %s952_s11 }
 0x35e   : > { %v451_v19 = vpop.f32.mrf.mxu1 }
 0x360   : > { %v507_v20 = vpop.f32.mrf.mxu2 }
 0x3b1   : > { %v515_v23 = vpop.permute.xlu2 %514 }
 0x3bb   : > { %v511_v21 = vpop.permute.xlu1 %510 }
 0x3bc   : > { %v521_v22 = vsel %vm286_vm1, %v336_v13, %v511_v21 }
 0x3bd   : > { %v523_v25 = vsel %vm522_vm3, %v521_v22, %v515_v23 }
 0x3cb   : > { %v519_v24 = vpop.permute.xlu1 %518 }
 0x3cc   : > { %v525_v26 = vsel %vm524_vm4, %v523_v25, %v519_v24 }
 0x3cd   : > { %526 = vst.msk [vmem:[%s237_s20] sm:$0xff] %vm263_vm0, %v525_v26 }
 0x3ce   : > { %875 = shalt.err (!%p872_p13)
}
 0x3cf   : > { %688 = dma.vmem_to_hbm [thread:$0]  (%p1044_p4), %s542_s21, 128, %s544_s22, %s528_s15  }
 0x3d0 PF: > { %s555_s28 = sand.u32 1, %s914_s12   ;;  %p699_p0 = pnand %p652_p6, %p1052_p7 }
 0x3d1   : > { %s556_s11 = scalar_lea.sflag [#allocation4], %s555_s28 }
 0x3d2   : > { %p700_p2 = pneg %p699_p0 }
 0x3d4   : > { %909 = dma.done.wait (%p700_p2), %s556_s11, 128  }
 0x3d5   : > { %911 = vsyncadd (%p700_p2), %s556_s11, 4294967168  ;;  %s20_s17 = sadd.s32 1, %s934_s17   ;;  %s1167_s12 = smov %s918_s13 }
 0x3d6   : > { %p17_p5 = scmp.ge.s32.totalorder %s20_s17, 4   ;;  %s1168_s13 = smov %s922_s14 }
 0x3d7   : > { %s1169_s14 = smov %s1050_s8  ;;  %s1170_s15 = smov %s930_s16 }
 0x3d8   : > { %s1171_s16 = smov %s1173_s29  ;;  %19 = sbr.rel (!%p17_p5) target bundleno = 7 (0x7), region = 85 }
 0x3dd   :  { %562 = vsyncpa [#allocation3], 1 }
 0x3de   :  { %564 = vsyncpa [#allocation3 + $0x1], 1 }
 0x3df   :  { %565 = vsyncpa [#allocation6], 1 }
 0x3e0   :  { %566 = vsyncpa [#allocation4], 1 }
 0x3e1   :  { %568 = vsyncpa [#allocation4 + $0x1], 1 }

</bundles_post_ra>
